<compile_context>
chip_gen: v5e
topology: v5e:2x2
jax: 0.10.0
libtpu: 0.0.40
codegen_flags: <defaults>
</compile_context>

<pallas_src>
import functools

import jax
import jax.numpy as jnp
from jax import lax
from jax.experimental import pallas as pl
from jax.experimental.pallas import tpu as pltpu


# ----------------------------------------------------------------------------
# Kernels
# ----------------------------------------------------------------------------
_CONTRACT_LAST = (((1,), (1,)), ((), ()))  # x (tm, tk) . W (tn, tk) -> (tm, tn)


def _spatial_fc_kernel_direct(x_ref, w_ref, o_ref):
    """f32 output: accumulate directly into the resident output block."""
    k = pl.program_id(2)

    @pl.when(k == 0)
    def _():
        o_ref[...] = jnp.zeros_like(o_ref)

    o_ref[...] += lax.dot_general(
        x_ref[...],
        w_ref[...],
        dimension_numbers=_CONTRACT_LAST,
        preferred_element_type=jnp.float32,
    )


def _spatial_fc_kernel_acc(x_ref, w_ref, o_ref, acc_ref):
    """Low-precision output: accumulate in an f32 VMEM scratch, cast at the end."""
    k = pl.program_id(2)

    @pl.when(k == 0)
    def _():
        acc_ref[...] = jnp.zeros_like(acc_ref)

    acc_ref[...] += lax.dot_general(
        x_ref[...],
        w_ref[...],
        dimension_numbers=_CONTRACT_LAST,
        preferred_element_type=jnp.float32,
    )

    @pl.when(k == pl.num_programs(2) - 1)
    def _():
        o_ref[...] = acc_ref[...].astype(o_ref.dtype)


# ----------------------------------------------------------------------------
# Tiling helpers
# ----------------------------------------------------------------------------
def _pick_tile(dim, target, align):
    """Largest multiple of `align` that divides `dim`, is <= target; else full dim."""
    if dim % align != 0:
        return dim  # non-aligned dim: take the full extent (allowed by Pallas)
    t = min(target, dim)
    t = (t // align) * align
    while t > 0 and dim % t != 0:
        t -= align
    return dim if t <= 0 else t


def _sublane_align(dtype):
    itemsize = jnp.dtype(dtype).itemsize
    return {4: 8, 2: 16, 1: 32}.get(itemsize, 8)


# ----------------------------------------------------------------------------
# Wrapper
# ----------------------------------------------------------------------------
def spatial_fc(x, weight, *, tm_target=256, tn_target=512, tk_target=512):
    """Apply SpatialFc: flatten spatial dims, y = x @ weight.T, reshape back.

    x      : (B, C, *spatial)
    weight : (N, N) with N = prod(spatial)   (PyTorch nn.Linear convention)
    """
    shape = x.shape
    B, C = shape[0], shape[1]
    N = 1
    for s in shape[2:]:
        N *= s
    assert weight.shape == (N, N), f"weight must be ({N},{N}), got {weight.shape}"

    M = B * C
    x2d = x.reshape(M, N)

    # Tile sizes: per-generation-safe few-MiB tiles; collapse for small problems.
    tm = _pick_tile(M, tm_target, _sublane_align(x.dtype))
    tn = _pick_tile(N, tn_target, 128)
    tk = _pick_tile(N, tk_target, 128)

    grid = (M // tm, N // tn, N // tk)

    in_specs = [
        pl.BlockSpec((tm, tk), lambda i, j, k: (i, k)),  # x tile
        pl.BlockSpec((tn, tk), lambda i, j, k: (j, k)),  # untransposed W tile
    ]
    out_specs = pl.BlockSpec((tm, tn), lambda i, j, k: (i, j))

    itemsize = jnp.dtype(x.dtype).itemsize
    cost = pl.CostEstimate(
        flops=2 * M * N * N,
        transcendentals=0,
        bytes_accessed=itemsize * (2 * M * N + N * N * max(1, M // tm)),
    )

    use_direct = x.dtype == jnp.float32
    kernel = _spatial_fc_kernel_direct if use_direct else _spatial_fc_kernel_acc
    scratch_shapes = () if use_direct else (pltpu.VMEM((tm, tn), jnp.float32),)

    out2d = pl.pallas_call(
        kernel,
        out_shape=jax.ShapeDtypeStruct((M, N), x.dtype),
        grid_spec=pltpu.PrefetchScalarGridSpec(
            num_scalar_prefetch=0,
            grid=grid,
            in_specs=in_specs,
            out_specs=out_specs,
            scratch_shapes=scratch_shapes,
        ),
        compiler_params=pltpu.CompilerParams(
            dimension_semantics=("parallel", "parallel", "arbitrary")
        ),
        cost_estimate=cost,
    )(x2d, weight)

    return out2d.reshape(shape)


def reference_spatial_fc(x, weight):
    shape = x.shape
    x2d = x.reshape(shape[0], shape[1], -1)
    y = jnp.einsum("bcn,mn->bcm", x2d, weight)
    return y.reshape(shape)


if __name__ == "__main__":
    # Small shapes: B=2, C=4, spatial = (16, 16) -> N = 256
    B, C, H, W = 2, 4, 16, 16
    N = H * W

    key = jax.random.PRNGKey(0)
    kx, kw = jax.random.split(key)
    x = jax.random.normal(kx, (B, C, H, W), dtype=jnp.float32)

    # Deterministic weight init (nn.Linear default is U(-1/sqrt(N), 1/sqrt(N))).
    bound = 1.0 / jnp.sqrt(jnp.float32(N))
    weight = jax.random.uniform(
        kw, (N, N), dtype=jnp.float32, minval=-bound, maxval=bound
    )

    fn = jax.jit(functools.partial(spatial_fc))
    y = fn(x, weight)
    y = jax.block_until_ready(y)

    y_ref = reference_spatial_fc(x, weight)
    assert y.shape == x.shape
    assert jnp.allclose(y, y_ref, atol=1e-4, rtol=1e-4)

    print("KERNEL_OK")
</pallas_src>

<mosaic_0001>
module attributes {stable_mosaic.version = 11 : i64} {
  func.func @_spatial_fc_kernel_direct(%arg0: i32, %arg1: i32, %arg2: i32, %arg3: memref<8x256xf32, #tpu.memory_space<vmem>>, %arg4: memref<256x256xf32, #tpu.memory_space<vmem>>, %arg5: memref<8x256xf32, #tpu.memory_space<vmem>>) attributes {dimension_semantics = [#tpu.dimension_semantics<parallel>, #tpu.dimension_semantics<parallel>, #tpu.dimension_semantics<arbitrary>], iteration_bounds = array<i64: 1, 1, 1>, scalar_prefetch = 0 : i64, scratch_operands = 0 : i64, tpu.core_type = #tpu.core_type<tc>, window_params = [{transform_indices = @transform_0, window_bounds = array<i64: 8, 256>}, {transform_indices = @transform_1, window_bounds = array<i64: 256, 256>}, {transform_indices = @transform_2, window_bounds = array<i64: 8, 256>}]} {
    %c0_i32 = arith.constant 0 : i32
    %0 = arith.cmpi eq, %arg2, %c0_i32 : i32
    %1 = arith.extui %0 : i1 to i32
    %c0_i32_0 = arith.constant 0 : i32
    %2 = arith.cmpi ne, %1, %c0_i32_0 : i32
    scf.if %2 {
      %cst_8 = arith.constant 0.000000e+00 : f32
      %9 = vector.broadcast %cst_8 : f32 to vector<8x256xf32>
      %c0_9 = arith.constant 0 : index
      %c0_10 = arith.constant 0 : index
      %10 = vector.load %arg5[%c0_9, %c0_10] : memref<8x256xf32, #tpu.memory_space<vmem>>, vector<8x256xf32>
      tpu.vector_store %arg5[%c0_9, %c0_10], %9 {strides = array<i32>} : memref<8x256xf32, #tpu.memory_space<vmem>>, vector<8x256xf32>,
    } else {
    }
    %c0 = arith.constant 0 : index
    %c0_1 = arith.constant 0 : index
    %3 = vector.load %arg5[%c0, %c0_1] : memref<8x256xf32, #tpu.memory_space<vmem>>, vector<8x256xf32>
    %c0_2 = arith.constant 0 : index
    %c0_3 = arith.constant 0 : index
    %4 = vector.load %arg3[%c0_2, %c0_3] : memref<8x256xf32, #tpu.memory_space<vmem>>, vector<8x256xf32>
    %c0_4 = arith.constant 0 : index
    %c0_5 = arith.constant 0 : index
    %5 = vector.load %arg4[%c0_4, %c0_5] : memref<256x256xf32, #tpu.memory_space<vmem>>, vector<256x256xf32>
    %cst = arith.constant dense<0.000000e+00> : vector<8x256xf32>
    %6 = tpu.matmul %4, %5, %cst {dimension_numbers = #tpu.dot_dimension_numbers<[1], [1], [0], [0], [0, 0, 1, 0], [], []>} : vector<8x256xf32>, vector<256x256xf32>, vector<8x256xf32> -> vector<8x256xf32>
    %7 = arith.addf %3, %6 : vector<8x256xf32>
    %c0_6 = arith.constant 0 : index
    %c0_7 = arith.constant 0 : index
    %8 = vector.load %arg5[%c0_6, %c0_7] : memref<8x256xf32, #tpu.memory_space<vmem>>, vector<8x256xf32>
    tpu.vector_store %arg5[%c0_6, %c0_7], %7 {strides = array<i32>} : memref<8x256xf32, #tpu.memory_space<vmem>>, vector<8x256xf32>,
    return
  }
  func.func @transform_0(%arg0: i32, %arg1: i32, %arg2: i32) -> (i32, i32) {
    %c0_i32 = arith.constant 0 : i32
    return %arg0, %arg2 : i32, i32
  }
  func.func @transform_1(%arg0: i32, %arg1: i32, %arg2: i32) -> (i32, i32) {
    %c0_i32 = arith.constant 0 : i32
    return %arg1, %arg2 : i32, i32
  }
  func.func @transform_2(%arg0: i32, %arg1: i32, %arg2: i32) -> (i32, i32) {
    %c0_i32 = arith.constant 0 : i32
    return %arg0, %arg1 : i32, i32
  }
}

</mosaic_0001>

<bundles_post_ra>
// kernel: spatial_fc.1
= control target key start
LH: loop header
LB: loop body
LE: loop exit
PB: predicated region body
PF: predicated region fallthrough
CT: control target
= control target key end

     0   :  { %7 = vsyncpa [#allocation3], 0  ;;  %s220_s12 = smov [#allocation2]   ;;  %s221_s14 = smov 256   ;;  %s253_s0 = inlined_call_operand.vmem [shape: f32[8,256], index: 0, kind: input, shape index: {}]   ;;  %s254_s1 = inlined_call_operand.hbm [shape: f32[256,256], index: 1, kind: input, shape index: {}]   ;;  %s255_s2 = inlined_call_operand.vmem [shape: f32[8,256], index: 2, kind: output, shape index: {}]  }
   0x1   :  { %s14_s11 = sshll.u32 %s254_s1, 4  ;;  %s16_s13 = sshll.u32 %s220_s12, 4  ;;  %s15_s11 = int_to_ptr.hbm [resolvable:$true] %s14_s11  ;;  %s17_s13 = int_to_ptr.vmem [resolvable:$true] %s16_s13 }
   0x2   :  { %s222_s15 = smov 16  }
   0x3   :  { %22 = dma.hbm_to_vmem [thread:$0]  %s15_s11, 8192, %s17_s13, [#allocation3], %s221_s14, %s221_s14, %s222_s15  }
   0x4   :  { %218 = dma.done.wait [#allocation3], 8192  }
   0x5   :  { %219 = vsyncadd [#allocation3], 4294959104  ;;  %v99_v0 = vld [vmem:[#allocation2 + $0x1f0] sm:$0xff]  ;;  %v100_v1 = vld [vmem:[#allocation2 + $0x1f8] sm:$0xff] }
   0x6   :  { %141 = vmatpush.xpose.msra.mxu2 %v99_v0  ;;  %161 = vmatpush.xpose.msra.mxu3 %v100_v1  ;;  %v67_v2 = vld [vmem:[#allocation2 + $0xf0] sm:$0xff]  ;;  %v68_v3 = vld [vmem:[#allocation2 + $0xf8] sm:$0xff]  ;;  %v97_v4 = vld [vmem:[#allocation2 + $0x1e0] sm:$0xff] }
   0x7   :  { %v98_v5 = vld [vmem:[#allocation2 + $0x1e8] sm:$0xff]  ;;  %101 = vmatpush.xpose.msra.mxu0 %v67_v2  ;;  %121 = vmatpush.xpose.msra.mxu1 %v68_v3  ;;  %v65_v6 = vld [vmem:[#allocation2 + $0xe0] sm:$0xff]  ;;  %v95_v8 = vld [vmem:[#allocation2 + $0x1d0] sm:$0xff] }
   0x8   :  { %v66_v7 = vld [vmem:[#allocation2 + $0xe8] sm:$0xff]  ;;  %v96_v9 = vld [vmem:[#allocation2 + $0x1d8] sm:$0xff]  ;;  %v63_v10 = vld [vmem:[#allocation2 + $0xd0] sm:$0xff] }
   0x9   :  { %v64_v11 = vld [vmem:[#allocation2 + $0xd8] sm:$0xff]  ;;  %v93_v12 = vld [vmem:[#allocation2 + $0x1c0] sm:$0xff]  ;;  %v94_v13 = vld [vmem:[#allocation2 + $0x1c8] sm:$0xff] }
   0xa   :  { %142 = vmatpush.xpose.msra.mxu2 %v97_v4  ;;  %162 = vmatpush.xpose.msra.mxu3 %v98_v5  ;;  %v61_v14 = vld [vmem:[#allocation2 + $0xc0] sm:$0xff]  ;;  %v62_v15 = vld [vmem:[#allocation2 + $0xc8] sm:$0xff]  ;;  %v91_v16 = vld [vmem:[#allocation2 + $0x1b0] sm:$0xff] }
   0xb   :  { %102 = vmatpush.xpose.msra.mxu0 %v65_v6  ;;  %122 = vmatpush.xpose.msra.mxu1 %v66_v7  ;;  %v92_v17 = vld [vmem:[#allocation2 + $0x1b8] sm:$0xff]  ;;  %v59_v18 = vld [vmem:[#allocation2 + $0xb0] sm:$0xff]  ;;  %v89_v20 = vld [vmem:[#allocation2 + $0x1a0] sm:$0xff] }
   0xc   :  { %v60_v19 = vld [vmem:[#allocation2 + $0xb8] sm:$0xff]  ;;  %v90_v21 = vld [vmem:[#allocation2 + $0x1a8] sm:$0xff]  ;;  %v57_v22 = vld [vmem:[#allocation2 + $0xa0] sm:$0xff] }
   0xd   :  { %v58_v23 = vld [vmem:[#allocation2 + $0xa8] sm:$0xff]  ;;  %v87_v24 = vld [vmem:[#allocation2 + $0x190] sm:$0xff]  ;;  %v88_v25 = vld [vmem:[#allocation2 + $0x198] sm:$0xff] }
   0xe   :  { %143 = vmatpush.xpose.msra.mxu2 %v95_v8  ;;  %163 = vmatpush.xpose.msra.mxu3 %v96_v9  ;;  %v55_v26 = vld [vmem:[#allocation2 + $0x90] sm:$0xff]  ;;  %v56_v27 = vld [vmem:[#allocation2 + $0x98] sm:$0xff]  ;;  %v85_v28 = vld [vmem:[#allocation2 + $0x180] sm:$0xff] }
   0xf   :  { %103 = vmatpush.xpose.msra.mxu0 %v63_v10  ;;  %123 = vmatpush.xpose.msra.mxu1 %v64_v11  ;;  %v86_v29 = vld [vmem:[#allocation2 + $0x188] sm:$0xff]  ;;  %v53_v30 = vld [vmem:[#allocation2 + $0x80] sm:$0xff]  ;;  %v83_v32 = vld [vmem:[#allocation2 + $0x170] sm:$0xff] }
  0x10   :  { %v54_v31 = vld [vmem:[#allocation2 + $0x88] sm:$0xff]  ;;  %v84_v33 = vld [vmem:[#allocation2 + $0x178] sm:$0xff]  ;;  %v51_v34 = vld [vmem:[#allocation2 + $0x70] sm:$0xff] }
  0x11   :  { %v52_v35 = vld [vmem:[#allocation2 + $0x78] sm:$0xff]  ;;  %v81_v36 = vld [vmem:[#allocation2 + $0x160] sm:$0xff]  ;;  %v82_v37 = vld [vmem:[#allocation2 + $0x168] sm:$0xff] }
  0x12   :  { %144 = vmatpush.xpose.msra.mxu2 %v93_v12  ;;  %164 = vmatpush.xpose.msra.mxu3 %v94_v13  ;;  %v49_v38 = vld [vmem:[#allocation2 + $0x60] sm:$0xff]  ;;  %v50_v39 = vld [vmem:[#allocation2 + $0x68] sm:$0xff]  ;;  %v79_v40 = vld [vmem:[#allocation2 + $0x150] sm:$0xff] }
  0x13   :  { %104 = vmatpush.xpose.msra.mxu0 %v61_v14  ;;  %124 = vmatpush.xpose.msra.mxu1 %v62_v15  ;;  %v80_v41 = vld [vmem:[#allocation2 + $0x158] sm:$0xff]  ;;  %v47_v42 = vld [vmem:[#allocation2 + $0x50] sm:$0xff]  ;;  %v77_v44 = vld [vmem:[#allocation2 + $0x140] sm:$0xff] }
  0x14   :  { %v48_v43 = vld [vmem:[#allocation2 + $0x58] sm:$0xff]  ;;  %v78_v45 = vld [vmem:[#allocation2 + $0x148] sm:$0xff]  ;;  %v45_v46 = vld [vmem:[#allocation2 + $0x40] sm:$0xff] }
  0x15   :  { %v46_v47 = vld [vmem:[#allocation2 + $0x48] sm:$0xff]  ;;  %v75_v48 = vld [vmem:[#allocation2 + $0x130] sm:$0xff]  ;;  %v76_v49 = vld [vmem:[#allocation2 + $0x138] sm:$0xff] }
  0x16   :  { %145 = vmatpush.xpose.msra.mxu2 %v91_v16  ;;  %165 = vmatpush.xpose.msra.mxu3 %v92_v17  ;;  %v43_v50 = vld [vmem:[#allocation2 + $0x30] sm:$0xff]  ;;  %v44_v51 = vld [vmem:[#allocation2 + $0x38] sm:$0xff]  ;;  %v73_v52 = vld [vmem:[#allocation2 + $0x120] sm:$0xff] }
  0x17   :  { %105 = vmatpush.xpose.msra.mxu0 %v59_v18  ;;  %125 = vmatpush.xpose.msra.mxu1 %v60_v19  ;;  %v74_v53 = vld [vmem:[#allocation2 + $0x128] sm:$0xff]  ;;  %v41_v54 = vld [vmem:[#allocation2 + $0x20] sm:$0xff]  ;;  %v71_v56 = vld [vmem:[#allocation2 + $0x110] sm:$0xff] }
  0x18   :  { %v42_v55 = vld [vmem:[#allocation2 + $0x28] sm:$0xff]  ;;  %v72_v57 = vld [vmem:[#allocation2 + $0x118] sm:$0xff]  ;;  %v39_v58 = vld [vmem:[#allocation2 + $0x10] sm:$0xff] }
  0x19   :  { %v40_v59 = vld [vmem:[#allocation2 + $0x18] sm:$0xff]  ;;  %v69_v60 = vld [vmem:[#allocation2 + $0x100] sm:$0xff]  ;;  %v70_v61 = vld [vmem:[#allocation2 + $0x108] sm:$0xff] }
  0x1a   :  { %146 = vmatpush.xpose.msra.mxu2 %v89_v20  ;;  %166 = vmatpush.xpose.msra.mxu3 %v90_v21  ;;  %v37_v62 = vld [vmem:[#allocation2] sm:$0xff]  ;;  %v38_v63 = vld [vmem:[#allocation2 + $0x8] sm:$0xff] }
  0x1b   :  { %106 = vmatpush.xpose.msra.mxu0 %v57_v22  ;;  %126 = vmatpush.xpose.msra.mxu1 %v58_v23  ;;  %v35_v0 = vld [vmem:[%s253_s0] sm:$0xff]  ;;  %v36_v1 = vld [vmem:[%s253_s0 + $0x8] sm:$0xff] }
  0x1e   :  { %147 = vmatpush.xpose.msra.mxu2 %v87_v24  ;;  %167 = vmatpush.xpose.msra.mxu3 %v88_v25 }
  0x1f   :  { %107 = vmatpush.xpose.msra.mxu0 %v55_v26  ;;  %127 = vmatpush.xpose.msra.mxu1 %v56_v27 }
  0x22   :  { %148 = vmatpush.xpose.msra.mxu2 %v85_v28  ;;  %168 = vmatpush.xpose.msra.mxu3 %v86_v29 }
  0x23   :  { %108 = vmatpush.xpose.msra.mxu0 %v53_v30  ;;  %128 = vmatpush.xpose.msra.mxu1 %v54_v31 }
  0x26   :  { %149 = vmatpush.xpose.msra.mxu2 %v83_v32  ;;  %169 = vmatpush.xpose.msra.mxu3 %v84_v33 }
  0x27   :  { %109 = vmatpush.xpose.msra.mxu0 %v51_v34  ;;  %129 = vmatpush.xpose.msra.mxu1 %v52_v35 }
  0x2a   :  { %150 = vmatpush.xpose.msra.mxu2 %v81_v36  ;;  %170 = vmatpush.xpose.msra.mxu3 %v82_v37 }
  0x2b   :  { %110 = vmatpush.xpose.msra.mxu0 %v49_v38  ;;  %130 = vmatpush.xpose.msra.mxu1 %v50_v39 }
  0x2e   :  { %151 = vmatpush.xpose.msra.mxu2 %v79_v40  ;;  %171 = vmatpush.xpose.msra.mxu3 %v80_v41 }
  0x2f   :  { %111 = vmatpush.xpose.msra.mxu0 %v47_v42  ;;  %131 = vmatpush.xpose.msra.mxu1 %v48_v43 }
  0x32   :  { %152 = vmatpush.xpose.msra.mxu2 %v77_v44  ;;  %172 = vmatpush.xpose.msra.mxu3 %v78_v45 }
  0x33   :  { %112 = vmatpush.xpose.msra.mxu0 %v45_v46  ;;  %132 = vmatpush.xpose.msra.mxu1 %v46_v47 }
  0x36   :  { %153 = vmatpush.xpose.msra.mxu2 %v75_v48  ;;  %173 = vmatpush.xpose.msra.mxu3 %v76_v49 }
  0x37   :  { %113 = vmatpush.xpose.msra.mxu0 %v43_v50  ;;  %133 = vmatpush.xpose.msra.mxu1 %v44_v51 }
  0x3a   :  { %154 = vmatpush.xpose.msra.mxu2 %v73_v52  ;;  %174 = vmatpush.xpose.msra.mxu3 %v74_v53 }
  0x3b   :  { %114 = vmatpush.xpose.msra.mxu0 %v41_v54  ;;  %134 = vmatpush.xpose.msra.mxu1 %v42_v55 }
  0x3e   :  { %155 = vmatpush.xpose.msra.mxu2 %v71_v56  ;;  %175 = vmatpush.xpose.msra.mxu3 %v72_v57 }
  0x3f   :  { %115 = vmatpush.xpose.msra.mxu0 %v39_v58  ;;  %135 = vmatpush.xpose.msra.mxu1 %v40_v59 }
  0x42   :  { %156 = vmatpush.xpose.msra.mxu2 %v69_v60  ;;  %176 = vmatpush.xpose.msra.mxu3 %v70_v61 }
  0x43   :  { %116 = vmatpush.xpose.msra.mxu0 %v37_v62  ;;  %136 = vmatpush.xpose.msra.mxu1 %v38_v63 }
  0x45   :  { %157 = vmatmul.f32.vlgmr.msra.gmra.mxu2 %v35_v0  ;;  %177 = vmatmul.f32.vlgmr.msra.gmra.mxu3 %v36_v1 }
  0x46   :  { %117 = vmatmul.f32.vlgmr.msra.gmra.mxu0 %v35_v0  ;;  %137 = vmatmul.f32.vlgmr.msra.gmra.mxu1 %v36_v1 }
  0xc3   :  { %v118_v2 = vpop.f32.mrf.mxu0  ;;  %v138_v3 = vpop.f32.mrf.mxu1 }
  0xc4   :  { %v139_v4 = vadd.f32 %v138_v3, %v118_v2 }
  0xc6   :  { %183 = vst [vmem:[%s255_s2] sm:$0xff] %v139_v4 }
  0xc8   :  { %v158_v5 = vpop.f32.mrf.mxu2  ;;  %v178_v6 = vpop.f32.mrf.mxu3 }
  0xc9   :  { %v179_v7 = vadd.f32 %v178_v6, %v158_v5 }
  0xcb   :  { %184 = vst [vmem:[%s255_s2 + $0x8] sm:$0xff] %v179_v7 }
  0xcc   :  { %189 = vsyncpa [#allocation3], 1 }

</bundles_post_ra>
